<compile_context>
chip_gen: v7x
topology: tpu7x:2x2x1
jax: 0.10.0
libtpu: 0.0.40
codegen_flags: <defaults>
</compile_context>

<pallas_src>
import jax
import jax.numpy as jnp
from jax.experimental import pallas as pl
from jax.experimental.pallas import tpu as pltpu


def _siamese_kernel(x_ref, w1_ref, b1_ref, w2_ref, b2_ref, out_ref):
    # x_ref:  (TB, D)   bf16   (one batch tile; pair axis folded into batch)
    # w1_ref: (D, H)    bf16   (shared, VMEM-resident across the whole grid)
    # b1_ref: (1, H)    f32
    # w2_ref: (H, E)    bf16   (shared)
    # b2_ref: (1, E)    f32
    # out_ref:(TB, E)   f32
    # Hidden layer: bf16 MXU matmul with f32 accumulation, f32 epilogue.
    h = jnp.dot(x_ref[...], w1_ref[...], preferred_element_type=jnp.float32)
    h = jnp.maximum(h + b1_ref[...], 0.0)
    # Embedding layer: back to bf16 for the MXU, accumulate in f32.
    out = jnp.dot(h.astype(w2_ref.dtype), w2_ref[...],
                  preferred_element_type=jnp.float32) + b2_ref[...]
    out_ref[...] = out.astype(out_ref.dtype)


def _pick_batch_tile(rows):
    # Prefer large, sublane-aligned batch tiles (pipelining sweet spot is
    # 256-512 rows); fall back to the full extent when the row count is small
    # or not a multiple of 8 (a full-extent block is always legal).
    for tb in (512, 256, 128, 64, 32, 16, 8):
        if rows % tb == 0:
            return tb
    return rows


def _make_siamese_call(in_dim, hidden_dim, embed_dim, rows):
    tb = _pick_batch_tile(rows)
    grid = (rows // tb,)  # single batch-tile axis (pair folded into rows)

    # Input: (2B, D); one (TB, D) tile per grid step.
    x_spec = pl.BlockSpec((tb, in_dim), lambda i: (i, 0))
    # Weights / biases: constant index_map -> fetched once, VMEM-resident.
    w1_spec = pl.BlockSpec((in_dim, hidden_dim), lambda i: (0, 0))
    b1_spec = pl.BlockSpec((1, hidden_dim), lambda i: (0, 0))
    w2_spec = pl.BlockSpec((hidden_dim, embed_dim), lambda i: (0, 0))
    b2_spec = pl.BlockSpec((1, embed_dim), lambda i: (0, 0))
    out_spec = pl.BlockSpec((tb, embed_dim), lambda i: (i, 0))

    return pl.pallas_call(
        _siamese_kernel,
        out_shape=jax.ShapeDtypeStruct((rows, embed_dim), jnp.float32),
        grid_spec=pltpu.PrefetchScalarGridSpec(
            num_scalar_prefetch=0,
            grid=grid,
            in_specs=[x_spec, w1_spec, b1_spec, w2_spec, b2_spec],
            out_specs=out_spec,
        ),
        compiler_params=pltpu.CompilerParams(
            # Batch tiles are independent -> megacore / 2-TC sharding on v7x.
            dimension_semantics=("parallel",),
        ),
    )


def siamese_forward(input1, input2, params):
    """Mirrors SiameseNetwork.forward: shared base_network applied to both inputs."""
    w1, b1, w2, b2 = params
    b = input1.shape[0]
    in_dim = 1
    for d in input1.shape[1:]:
        in_dim *= d
    hidden_dim = w1.shape[1]
    embed_dim = w2.shape[1]

    # Fold the Siamese pair into the batch axis: the base network is shared,
    # so one (2B, D) pass is identical to two (B, D) passes, with one kernel
    # launch, one weight fetch, and better MXU occupancy for small B.
    x = jnp.concatenate(
        [input1.reshape(b, in_dim), input2.reshape(b, in_dim)], axis=0
    ).astype(jnp.bfloat16)
    w1b = w1.astype(jnp.bfloat16)
    w2b = w2.astype(jnp.bfloat16)
    b1f = b1.astype(jnp.float32)
    b2f = b2.astype(jnp.float32)

    call = _make_siamese_call(in_dim, hidden_dim, embed_dim, 2 * b)
    out = call(x, w1b, b1f, w2b, b2f)          # (2B, E) f32
    return out[:b], out[b:]                    # shared weights == siamese


def _init_params(key, in_dim, hidden_dim, embed_dim, dtype=jnp.float32):
    k1, k2, k3, k4 = jax.random.split(key, 4)
    w1 = jax.random.normal(k1, (in_dim, hidden_dim), dtype) * 0.02
    b1 = jax.random.normal(k2, (1, hidden_dim), dtype) * 0.02
    w2 = jax.random.normal(k3, (hidden_dim, embed_dim), dtype) * 0.02
    b2 = jax.random.normal(k4, (1, embed_dim), dtype) * 0.02
    return (w1, b1, w2, b2)


if __name__ == "__main__":
    key = jax.random.PRNGKey(0)
    k_in1, k_in2, k_par = jax.random.split(key, 3)

    B, C, H, W = 2, 4, 16, 16            # NCHW inputs, as the PyTorch module implies
    HIDDEN, EMBED = 32, 16

    input1 = jax.random.normal(k_in1, (B, C, H, W), jnp.float32)
    input2 = jax.random.normal(k_in2, (B, C, H, W), jnp.float32)
    params = _init_params(k_par, C * H * W, HIDDEN, EMBED)

    fwd = jax.jit(siamese_forward)
    out1, out2 = fwd(input1, input2, params)
    jax.block_until_ready((out1, out2))

    # Reference check (pure JAX, same bf16-inputs / f32-accumulation recipe).
    w1, b1, w2, b2 = params

    def ref(x):
        xb = x.reshape(B, -1).astype(jnp.bfloat16)
        h = jnp.dot(xb, w1.astype(jnp.bfloat16),
                    preferred_element_type=jnp.float32) + b1
        h = jnp.maximum(h, 0.0)
        return jnp.dot(h.astype(jnp.bfloat16), w2.astype(jnp.bfloat16),
                       preferred_element_type=jnp.float32) + b2

    assert out1.shape == (B, EMBED) and out2.shape == (B, EMBED)
    assert jnp.allclose(out1, ref(input1), atol=1e-2, rtol=1e-2)
    assert jnp.allclose(out2, ref(input2), atol=1e-2, rtol=1e-2)

    print("KERNEL_OK")
</pallas_src>

<mosaic_0001>
module attributes {stable_mosaic.version = 11 : i64} {
  func.func @_siamese_kernel(%arg0: i32, %arg1: memref<4x1024xbf16, #tpu.memory_space<vmem>>, %arg2: memref<1024x32xbf16, #tpu.memory_space<vmem>>, %arg3: memref<1x32xf32, #tpu.memory_space<vmem>>, %arg4: memref<32x16xbf16, #tpu.memory_space<vmem>>, %arg5: memref<1x16xf32, #tpu.memory_space<vmem>>, %arg6: memref<4x16xf32, #tpu.memory_space<vmem>>) attributes {dimension_semantics = [#tpu.dimension_semantics<parallel>], iteration_bounds = array<i64: 1>, scalar_prefetch = 0 : i64, scratch_operands = 0 : i64, tpu.core_type = #tpu.core_type<tc>, window_params = [{transform_indices = @transform_0, window_bounds = array<i64: 4, 1024>}, {pipeline_mode = #tpu.pipeline_mode<synchronous>, transform_indices = @transform_1, window_bounds = array<i64: 1024, 32>}, {pipeline_mode = #tpu.pipeline_mode<synchronous>, transform_indices = @transform_2, window_bounds = array<i64: 1, 32>}, {pipeline_mode = #tpu.pipeline_mode<synchronous>, transform_indices = @transform_3, window_bounds = array<i64: 32, 16>}, {pipeline_mode = #tpu.pipeline_mode<synchronous>, transform_indices = @transform_4, window_bounds = array<i64: 1, 16>}, {transform_indices = @transform_5, window_bounds = array<i64: 4, 16>}]} {
    %c0 = arith.constant 0 : index
    %c0_0 = arith.constant 0 : index
    %0 = vector.load %arg1[%c0, %c0_0] : memref<4x1024xbf16, #tpu.memory_space<vmem>>, vector<4x1024xbf16>
    %c0_1 = arith.constant 0 : index
    %c0_2 = arith.constant 0 : index
    %1 = vector.load %arg2[%c0_1, %c0_2] : memref<1024x32xbf16, #tpu.memory_space<vmem>>, vector<1024x32xbf16>
    %cst = arith.constant dense<0.000000e+00> : vector<4x32xf32>
    %2 = tpu.matmul %0, %1, %cst {dimension_numbers = #tpu.dot_dimension_numbers<[1], [0], [0], [1], [0, 0, 1, 1], [], []>} : vector<4x1024xbf16>, vector<1024x32xbf16>, vector<4x32xf32> -> vector<4x32xf32>
    %c0_3 = arith.constant 0 : index
    %c0_4 = arith.constant 0 : index
    %3 = vector.load %arg3[%c0_3, %c0_4] : memref<1x32xf32, #tpu.memory_space<vmem>>, vector<1x32xf32>
    %4 = vector.broadcast %3 : vector<1x32xf32> to vector<4x32xf32>
    %5 = arith.addf %2, %4 : vector<4x32xf32>
    %cst_5 = arith.constant 0.000000e+00 : f32
    %6 = vector.broadcast %cst_5 : f32 to vector<4x32xf32>
    %7 = arith.maximumf %5, %6 : vector<4x32xf32>
    %8 = arith.truncf %7 : vector<4x32xf32> to vector<4x32xbf16>
    %c0_6 = arith.constant 0 : index
    %c0_7 = arith.constant 0 : index
    %9 = vector.load %arg4[%c0_6, %c0_7] : memref<32x16xbf16, #tpu.memory_space<vmem>>, vector<32x16xbf16>
    %cst_8 = arith.constant dense<0.000000e+00> : vector<4x16xf32>
    %10 = tpu.matmul %8, %9, %cst_8 {dimension_numbers = #tpu.dot_dimension_numbers<[1], [0], [0], [1], [0, 0, 1, 1], [], []>} : vector<4x32xbf16>, vector<32x16xbf16>, vector<4x16xf32> -> vector<4x16xf32>
    %c0_9 = arith.constant 0 : index
    %c0_10 = arith.constant 0 : index
    %11 = vector.load %arg5[%c0_9, %c0_10] : memref<1x16xf32, #tpu.memory_space<vmem>>, vector<1x16xf32>
    %12 = vector.broadcast %11 : vector<1x16xf32> to vector<4x16xf32>
    %13 = arith.addf %10, %12 : vector<4x16xf32>
    %c0_11 = arith.constant 0 : index
    %c0_12 = arith.constant 0 : index
    %14 = vector.load %arg6[%c0_11, %c0_12] : memref<4x16xf32, #tpu.memory_space<vmem>>, vector<4x16xf32>
    tpu.vector_store %arg6[%c0_11, %c0_12], %13 {strides = array<i32>} : memref<4x16xf32, #tpu.memory_space<vmem>>, vector<4x16xf32>,
    return
  }
  func.func @transform_0(%arg0: i32) -> (i32, i32) {
    %c0_i32 = arith.constant 0 : i32
    %c0_i32_0 = arith.constant 0 : i32
    return %arg0, %c0_i32 : i32, i32
  }
  func.func @transform_1(%arg0: i32) -> (i32, i32) {
    %c0_i32 = arith.constant 0 : i32
    %c0_i32_0 = arith.constant 0 : i32
    %c0_i32_1 = arith.constant 0 : i32
    return %c0_i32, %c0_i32_0 : i32, i32
  }
  func.func @transform_2(%arg0: i32) -> (i32, i32) {
    %c0_i32 = arith.constant 0 : i32
    %c0_i32_0 = arith.constant 0 : i32
    %c0_i32_1 = arith.constant 0 : i32
    return %c0_i32, %c0_i32_0 : i32, i32
  }
  func.func @transform_3(%arg0: i32) -> (i32, i32) {
    %c0_i32 = arith.constant 0 : i32
    %c0_i32_0 = arith.constant 0 : i32
    %c0_i32_1 = arith.constant 0 : i32
    return %c0_i32, %c0_i32_0 : i32, i32
  }
  func.func @transform_4(%arg0: i32) -> (i32, i32) {
    %c0_i32 = arith.constant 0 : i32
    %c0_i32_0 = arith.constant 0 : i32
    %c0_i32_1 = arith.constant 0 : i32
    return %c0_i32, %c0_i32_0 : i32, i32
  }
  func.func @transform_5(%arg0: i32) -> (i32, i32) {
    %c0_i32 = arith.constant 0 : i32
    %c0_i32_0 = arith.constant 0 : i32
    return %arg0, %c0_i32 : i32, i32
  }
}

</mosaic_0001>

<bundles_post_ra>
// kernel: siamese_forward.1
= control target key start
LH: loop header
LB: loop body
LE: loop exit
PB: predicated region body
PF: predicated region fallthrough
CT: control target
= control target key end

     0   :  { %v1060_v22 = vmov 1983009808   ;;  %v164_v24 = vlaneseq  ;;  %vm1062_vm0 = vmmov 0   ;;  %vm771_vm1 = vcmask 261120   ;;  %s1316_s1 = inlined_call_operand.vmem [shape: bf16[1024,32], index: 1, kind: input, shape index: {}]   ;;  %s1317_s0 = inlined_call_operand.vmem [shape: bf16[4,1024], index: 0, kind: input, shape index: {}]   ;;  %s1318_s3 = inlined_call_operand.vmem [shape: bf16[32,16], index: 3, kind: input, shape index: {}]   ;;  %s1319_s2 = inlined_call_operand.vmem [shape: f32[1,32], index: 2, kind: input, shape index: {}]   ;;  %s1320_s4 = inlined_call_operand.vmem [shape: f32[1,16], index: 4, kind: input, shape index: {}]   ;;  %s1321_s5 = inlined_call_operand.vmem [shape: f32[4,16], index: 5, kind: output, shape index: {}]  }
   0x1   :  { %v992_v0 = vld [vmem:[%s1316_s1 + $0x40] sm:$0xff]   ;;  %v996_v4 = vld [vmem:[%s1316_s1 + $0x48] sm:$0xff]   ;;  %v1000_v8 = vld [vmem:[%s1316_s1 + $0x50] sm:$0xff]   ;;  %v162_v23 = vunpack.c.l.s4 %v1060_v22  ;;  %vm815_vm2 = vcmask 125952  }
   0x2   :  { %v993_v1 = vld [vmem:[%s1316_s1 + $0xc0] sm:$0xff]   ;;  %890 = vmatprep.subr.bf16.mxu0 %v992_v0  ;;  %v997_v5 = vld [vmem:[%s1316_s1 + $0xc8] sm:$0xff]   ;;  %v1001_v9 = vld [vmem:[%s1316_s1 + $0xd0] sm:$0xff]   ;;  %v165_v30 = vshrl.u32 %v164_v24, 7 }
   0x3   :  { %v994_v2 = vld [vmem:[%s1316_s1] sm:$0xff]   ;;  %912 = vmatprep.subr.bf16.mxu1 %v993_v1  ;;  %v998_v6 = vld [vmem:[%s1316_s1 + $0x8] sm:$0xff]   ;;  %v1002_v10 = vld [vmem:[%s1316_s1 + $0x10] sm:$0xff]   ;;  %v163_v29 = vunpack.c.0.s8 %v162_v23 }
   0x4   :  { %v995_v3 = vld [vmem:[%s1316_s1 + $0x80] sm:$0xff]   ;;  %891 = vmatpush3.bf16.msra.mxu0 %v994_v2  ;;  %v999_v7 = vld [vmem:[%s1316_s1 + $0x88] sm:$0xff]   ;;  %v1003_v11 = vld [vmem:[%s1316_s1 + $0x90] sm:$0xff]  }
   0x5   :  { %913 = vmatpush3.bf16.msra.mxu1 %v995_v3  ;;  %892 = vmatprep.subr.bf16.mxu0 %v996_v4  ;;  %v1004_v12 = vld [vmem:[%s1316_s1 + $0x58] sm:$0xff]   ;;  %v1008_v16 = vld [vmem:[%s1316_s1 + $0x60] sm:$0xff]   ;;  %v1012_v20 = vld [vmem:[%s1316_s1 + $0x68] sm:$0xff]   ;;  %v166_v35 = vsub.s32 %v163_v29, %v165_v30 }
   0x6   :  { %914 = vmatprep.subr.bf16.mxu1 %v997_v5  ;;  %v1005_v13 = vld [vmem:[%s1316_s1 + $0xd8] sm:$0xff]   ;;  %v1009_v17 = vld [vmem:[%s1316_s1 + $0xe0] sm:$0xff]   ;;  %v1013_v21 = vld [vmem:[%s1316_s1 + $0xe8] sm:$0xff]  }
   0x7   :  { %v1006_v14 = vld [vmem:[%s1316_s1 + $0x18] sm:$0xff]   ;;  %v1010_v18 = vld [vmem:[%s1316_s1 + $0x20] sm:$0xff]   ;;  %v1014_v25 = vld [vmem:[%s1316_s1 + $0x28] sm:$0xff]  }
   0x8   :  { %893 = vmatpush3.bf16.msra.mxu0 %v998_v6  ;;  %v1007_v15 = vld [vmem:[%s1316_s1 + $0x98] sm:$0xff]   ;;  %v1011_v19 = vld [vmem:[%s1316_s1 + $0xa0] sm:$0xff]   ;;  %v1015_v26 = vld [vmem:[%s1316_s1 + $0xa8] sm:$0xff]  }
   0x9   :  { %915 = vmatpush3.bf16.msra.mxu1 %v999_v7  ;;  %894 = vmatprep.subr.bf16.mxu0 %v1000_v8  ;;  %v1016_v27 = vld [vmem:[%s1316_s1 + $0x70] sm:$0xff]   ;;  %v1020_v33 = vld [vmem:[%s1316_s1 + $0x78] sm:$0xff]   ;;  %v21_v38 = vld [vmem:[%s1317_s0] sm:$0xff] }
   0xa   :  { %916 = vmatprep.subr.bf16.mxu1 %v1001_v9  ;;  %v1017_v28 = vld [vmem:[%s1316_s1 + $0xf0] sm:$0xff]   ;;  %v1021_v34 = vld [vmem:[%s1316_s1 + $0xf8] sm:$0xff]   ;;  %v22_v39 = vld [vmem:[%s1317_s0 + $0x8] sm:$0xff]  ;;  %v167_v40 = vrot.slane %v21_v38, %v166_v35  ;;  %v160_v42 = vcombine.high %v21_v38, %v21_v38 }
   0xb   :  { %v1018_v31 = vld [vmem:[%s1316_s1 + $0x30] sm:$0xff]   ;;  %v1022_v36 = vld [vmem:[%s1316_s1 + $0x38] sm:$0xff]   ;;  %v177_v41 = vcombine.high %v22_v39, %v22_v39  ;;  %v1026_v43 = vld [vmem:[%s1316_s1 + $0x140] sm:$0xff]   ;;  %v1198_v44 = vrot.slane %v22_v39, %v166_v35 }
   0xc   :  { %895 = vmatpush3.bf16.msra.mxu0 %v1002_v10  ;;  %v1019_v32 = vld [vmem:[%s1316_s1 + $0xb0] sm:$0xff]   ;;  %v1023_v37 = vld [vmem:[%s1316_s1 + $0xb8] sm:$0xff]   ;;  %v1027_v45 = vld [vmem:[%s1316_s1 + $0x1c0] sm:$0xff]   ;;  %v175_v46 = vcombine.high %v167_v40, %v167_v40  ;;  %v174_v47 = vrot.slane %v160_v42, %v166_v35 }
   0xd   :  { %917 = vmatpush3.bf16.msra.mxu1 %v1003_v11  ;;  %896 = vmatprep.subr.bf16.mxu0 %v1004_v12  ;;  %v1028_v48 = vld [vmem:[%s1316_s1 + $0x100] sm:$0xff]   ;;  %v1206_v49 = vrot.slane %v177_v41, %v166_v35  ;;  %v1030_v52 = vld [vmem:[%s1316_s1 + $0x148] sm:$0xff]   ;;  %v192_v53 = vcombine.high %v1198_v44, %v1198_v44  ;;  %v1034_v58 = vld [vmem:[%s1316_s1 + $0x150] sm:$0xff]  }
   0xe   :  { %918 = vmatprep.subr.bf16.mxu1 %v1005_v13  ;;  %v1029_v50 = vld [vmem:[%s1316_s1 + $0x180] sm:$0xff]   ;;  %618 = vmatprep.mubr.bf16.mxu0 %v175_v46  ;;  %v176_v51 = vcombine.high %v174_v47, %v174_v47  ;;  %v1031_v54 = vld [vmem:[%s1316_s1 + $0x1c8] sm:$0xff]   ;;  %v1035_v59 = vld [vmem:[%s1316_s1 + $0x1d0] sm:$0xff]  }
   0xf   :  { %v193_v55 = vcombine.high %v1206_v49, %v1206_v49  ;;  %v1032_v56 = vld [vmem:[%s1316_s1 + $0x108] sm:$0xff]   ;;  %v1036_v60 = vld [vmem:[%s1316_s1 + $0x110] sm:$0xff]   ;;  %v1038_v62 = vld [vmem:[%s1316_s1 + $0x158] sm:$0xff]  }
  0x10   :  { %897 = vmatpush3.bf16.msra.mxu0 %v1006_v14  ;;  %658 = vmatprep.mubr.bf16.mxu1 %v176_v51  ;;  %v1033_v57 = vld [vmem:[%s1316_s1 + $0x188] sm:$0xff]   ;;  %v1037_v61 = vld [vmem:[%s1316_s1 + $0x190] sm:$0xff]   ;;  %v1039_v63 = vld [vmem:[%s1316_s1 + $0x1d8] sm:$0xff]  }
  0x11   :  { %919 = vmatpush3.bf16.msra.mxu1 %v1007_v15  ;;  %898 = vmatprep.subr.bf16.mxu0 %v1008_v16  ;;  %v1040_v0 = vld [vmem:[%s1316_s1 + $0x118] sm:$0xff]   ;;  %v1042_v2 = vld [vmem:[%s1316_s1 + $0x160] sm:$0xff]   ;;  %v1046_v6 = vld [vmem:[%s1316_s1 + $0x168] sm:$0xff]  }
  0x12   :  { %920 = vmatprep.subr.bf16.mxu1 %v1009_v17  ;;  %v1041_v1 = vld [vmem:[%s1316_s1 + $0x198] sm:$0xff]   ;;  %v1043_v3 = vld [vmem:[%s1316_s1 + $0x1e0] sm:$0xff]   ;;  %v1047_v7 = vld [vmem:[%s1316_s1 + $0x1e8] sm:$0xff]  }
  0x13   :  { %v1044_v4 = vld [vmem:[%s1316_s1 + $0x120] sm:$0xff]   ;;  %v1048_v8 = vld [vmem:[%s1316_s1 + $0x128] sm:$0xff]   ;;  %v1050_v10 = vld [vmem:[%s1316_s1 + $0x170] sm:$0xff]  }
  0x14   :  { %899 = vmatpush3.bf16.msra.mxu0 %v1010_v18  ;;  %v1045_v5 = vld [vmem:[%s1316_s1 + $0x1a0] sm:$0xff]   ;;  %v1049_v9 = vld [vmem:[%s1316_s1 + $0x1a8] sm:$0xff]   ;;  %v1051_v11 = vld [vmem:[%s1316_s1 + $0x1f0] sm:$0xff]  }
  0x15   :  { %921 = vmatpush3.bf16.msra.mxu1 %v1011_v19  ;;  %900 = vmatprep.subr.bf16.mxu0 %v1012_v20  ;;  %v1052_v12 = vld [vmem:[%s1316_s1 + $0x130] sm:$0xff]   ;;  %v1054_v14 = vld [vmem:[%s1316_s1 + $0x178] sm:$0xff]   ;;  %v1058_v18 = vld [vmem:[%s1318_s3] sm:$0xff]   ;;  %v1061_v19 = vmov 0.0  }
  0x16   :  { %922 = vmatprep.subr.bf16.mxu1 %v1013_v21  ;;  %v1053_v13 = vld [vmem:[%s1316_s1 + $0x1b0] sm:$0xff]   ;;  %v1055_v15 = vld [vmem:[%s1316_s1 + $0x1f8] sm:$0xff]   ;;  %v1059_v20 = vld [vmem:[%s1318_s3 + $0x8] sm:$0xff]  }
  0x17   :  { %v1056_v16 = vld [vmem:[%s1316_s1 + $0x138] sm:$0xff]   ;;  %v821_v22 = vld [vmem:[%s1319_s2] ss:$0 sm:$0xff] }
  0x18   :  { %901 = vmatpush3.bf16.msra.mxu0 %v1014_v25  ;;  %v1057_v17 = vld [vmem:[%s1316_s1 + $0x1b8] sm:$0xff]  }
  0x19   :  { %923 = vmatpush3.bf16.msra.mxu1 %v1015_v26  ;;  %902 = vmatprep.subr.bf16.mxu0 %v1016_v27 }
  0x1a   :  { %924 = vmatprep.subr.bf16.mxu1 %v1017_v28 }
  0x1c   :  { %903 = vmatpush3.bf16.msra.mxu0 %v1018_v31 }
  0x1d   :  { %925 = vmatpush3.bf16.msra.mxu1 %v1019_v32  ;;  %904 = vmatprep.subr.bf16.mxu0 %v1020_v33 }
  0x1e   :  { %926 = vmatprep.subr.bf16.mxu1 %v1021_v34 }
  0x20   :  { %905 = vmatpush3.bf16.msra.mxu0 %v1022_v36 }
  0x21   :  { %927 = vmatpush3.bf16.msra.mxu1 %v1023_v37  ;;  %934 = vmatprep.subr.bf16.mxu0 %v1026_v43 }
  0x22   :  { %956 = vmatprep.subr.bf16.mxu1 %v1027_v45 }
  0x23   :  { %619 = vmatmul.mubr.bf16.vlgmr.msra.gmra.mrb[0].mxu0 %v167_v40 }
  0x24   :  { %935 = vmatpush3.bf16.msra.mxu0 %v1028_v48  ;;  %659 = vmatmul.mubr.bf16.vlgmr.msra.gmra.mrb[0].mxu1 %v174_v47  ;;  %v886_v48 = vld [vmem:[%s1320_s4] ss:$0 sm:$0xff] }
  0x25   :  { %936 = vmatprep.subr.bf16.mxu0 %v1030_v52  ;;  %957 = vmatpush3.bf16.msra.mxu1 %v1029_v50 }
  0x26   :  { %698 = vmatprep.mubr.bf16.mxu0 %v192_v53  ;;  %958 = vmatprep.subr.bf16.mxu1 %v1031_v54 }
  0x27   :  { %738 = vmatprep.mubr.bf16.mxu1 %v193_v55 }
  0x28   :  { %937 = vmatpush3.bf16.msra.mxu0 %v1032_v56 }
  0x29   :  { %938 = vmatprep.subr.bf16.mxu0 %v1034_v58  ;;  %959 = vmatpush3.bf16.msra.mxu1 %v1033_v57 }
  0x2a   :  { %960 = vmatprep.subr.bf16.mxu1 %v1035_v59 }
  0x2c   :  { %939 = vmatpush3.bf16.msra.mxu0 %v1036_v60 }
  0x2d   :  { %940 = vmatprep.subr.bf16.mxu0 %v1038_v62  ;;  %961 = vmatpush3.bf16.msra.mxu1 %v1037_v61 }
  0x2e   :  { %962 = vmatprep.subr.bf16.mxu1 %v1039_v63 }
  0x30   :  { %941 = vmatpush3.bf16.msra.mxu0 %v1040_v0 }
  0x31   :  { %942 = vmatprep.subr.bf16.mxu0 %v1042_v2  ;;  %963 = vmatpush3.bf16.msra.mxu1 %v1041_v1 }
  0x32   :  { %964 = vmatprep.subr.bf16.mxu1 %v1043_v3 }
  0x34   :  { %943 = vmatpush3.bf16.msra.mxu0 %v1044_v4 }
  0x35   :  { %944 = vmatprep.subr.bf16.mxu0 %v1046_v6  ;;  %965 = vmatpush3.bf16.msra.mxu1 %v1045_v5 }
  0x36   :  { %966 = vmatprep.subr.bf16.mxu1 %v1047_v7 }
  0x38   :  { %945 = vmatpush3.bf16.msra.mxu0 %v1048_v8 }
  0x39   :  { %946 = vmatprep.subr.bf16.mxu0 %v1050_v10  ;;  %967 = vmatpush3.bf16.msra.mxu1 %v1049_v9 }
  0x3a   :  { %968 = vmatprep.subr.bf16.mxu1 %v1051_v11 }
  0x3c   :  { %947 = vmatpush3.bf16.msra.mxu0 %v1052_v12 }
  0x3d   :  { %948 = vmatprep.subr.bf16.mxu0 %v1054_v14  ;;  %969 = vmatpush3.bf16.msra.mxu1 %v1053_v13 }
  0x3e   :  { %970 = vmatprep.subr.bf16.mxu1 %v1055_v15 }
  0x40   :  { %949 = vmatpush3.bf16.msra.mxu0 %v1056_v16 }
  0x41   :  { %971 = vmatpush3.bf16.msra.mxu1 %v1057_v17  ;;  %981 = vmatprep.subr.bf16.mxu0 %v1061_v19 }
  0x43   :  { %699 = vmatmul.mubr.bf16.vlgmr.msra.gmra.mrb[4].mxu0 %v1198_v44 }
  0x44   :  { %739 = vmatmul.mubr.bf16.vlgmr.msra.gmra.mrb[4].mxu1 %v1206_v49  ;;  %982 = vmatpush3.bf16.msra.mxu0 %v1058_v18 }
  0x45   :  { %983 = vmatprep.subr.bf16.mxu0 %v1061_v19  ;;  %985 = vmatprep.mubr.msk.bf16.mxu0 %vm1062_vm0, %v1061_v19 }
  0x48   :  { %984 = vmatpush3.bf16.msra.mxu0 %v1059_v20 }
  0xf6   :  { %v906_v21 = vpop.f32.mrb[0].mxu0 }
  0xf7   :  { %v907_v23 = vpop.f32.mrb[1].mxu0  ;;  %v928_v24 = vpop.f32.mrb[0].mxu1 }
  0xf8   :  { %v908_v25 = vadd.f32 %v907_v23, %v906_v21  ;;  %v909_v26 = vpop.f32.mrb[2].mxu0  ;;  %v929_v27 = vpop.f32.mrb[1].mxu1 }
  0xf9   :  { %v910_v28 = vpop.f32.mrb[3].mxu0  ;;  %v930_v30 = vadd.f32 %v929_v27, %v928_v24  ;;  %v931_v31 = vpop.f32.mrb[2].mxu1 }
  0xfa   :  { %v621_v29 = vadd.f32 %v908_v25, %v821_v22  ;;  %v932_v32 = vpop.f32.mrb[3].mxu1 }
  0xfc   :  { %v661_v33 = vadd.f32 %v930_v30, %v621_v29 }
 0x116   :  { %v950_v34 = vpop.f32.mrb[4].mxu0 }
 0x117   :  { %v951_v35 = vpop.f32.mrb[5].mxu0  ;;  %v972_v36 = vpop.f32.mrb[4].mxu1 }
 0x118   :  { %v952_v37 = vadd.f32 %v951_v35, %v950_v34  ;;  %v953_v38 = vpop.f32.mrb[6].mxu0  ;;  %v973_v39 = vpop.f32.mrb[5].mxu1 }
 0x119   :  { %v954_v40 = vpop.f32.mrb[7].mxu0  ;;  %v974_v42 = vadd.f32 %v973_v39, %v972_v36  ;;  %v975_v43 = vpop.f32.mrb[6].mxu1 }
 0x11a   :  { %v701_v41 = vadd.f32 %v952_v37, %v661_v33  ;;  %v976_v44 = vpop.f32.mrb[7].mxu1 }
 0x11c   :  { %v741_v45 = vadd.f32 %v974_v42, %v701_v41 }
 0x11e   :  { %v746_v46 = vmax.f32 %v741_v45, 0.0 }
 0x120   :  { %v747_v47 = vpack.c.bf16 %v746_v46, %v746_v46 }
 0x122   :  { %986 = vmatmul.mubr.msk.bf16.vlgmr.msra.gmra.mrb[8].mxu0 %vm771_vm1, %v747_v47 }
 0x1f5   :  { %v809_v49 = vpop.f32.mrb[8].mxu0 }
 0x1f6   :  { %v810_v50 = vadd.f32 %v886_v48, %v809_v49  ;;  %v987_v51 = vpop.f32.mrb[9].mxu0 }
 0x1f7   :  { %v812_v52 = vpop.f32.mrb[10].mxu0 }
 0x1f8   :  { %816 = vst.msk [vmem:[%s1321_s5] sm:$0xf] %vm815_vm2, %v810_v50  ;;  %v988_v53 = vpop.f32.mrb[11].mxu0 }

</bundles_post_ra>
